<compile_context>
chip_gen: v5e
topology: v5e:2x2
jax: 0.10.0
libtpu: 0.0.40
codegen_flags: <defaults>
</compile_context>

<pallas_src>
import jax
import jax.numpy as jnp
from jax.experimental import pallas as pl
from jax.experimental.pallas import tpu as pltpu


def _round_up(x, m):
    return (x + m - 1) // m * m


def _vmem_limit_bytes():
    """Per-generation VMEM limit: ~3/4 of physical capacity, capped at 96 MiB."""
    cap = 64 * 1024 * 1024          # conservative fallback (v7x physical per TC)
    try:
        info = pltpu.get_tpu_info()
        cap = int(getattr(info, "vmem_capacity_bytes", cap))
    except Exception:
        pass
    return int(min(cap * 3 // 4, 96 * 1024 * 1024))


def _conv_stats_kernel(w_ref, p_ref, sum_ref, sumsq_ref):
    """Pass 1: conv tile (not stored) -> per-channel partial sum / sum-of-squares.

    w_ref:   (Cpad8, K)       folded 3x3 weights, K = KH*KW*Cin
    p_ref:   (K, r_tile)      im2col patch slab, flattened spatial on lanes
    sum_ref/sumsq_ref: (Cpad8, 1) per-tile per-channel partials
    """
    acc = jnp.dot(w_ref[...], p_ref[...], preferred_element_type=jnp.float32)
    # Cross-lane reduce on the XLU (which has slack here); channels stay on sublanes.
    sum_ref[...] = jnp.sum(acc, axis=1, keepdims=True)
    sumsq_ref[...] = jnp.sum(acc * acc, axis=1, keepdims=True)


def _conv_bn_relu_kernel(w_ref, p_ref, scale_ref, shift_ref, o_ref):
    """Pass 2: recompute conv tile, y = relu(conv*scale + shift), lane-dense store."""
    acc = jnp.dot(w_ref[...], p_ref[...], preferred_element_type=jnp.float32)
    y = acc * scale_ref[...] + shift_ref[...]
    o_ref[...] = jnp.maximum(y, 0.0).astype(o_ref.dtype)


def conv3x3_bn_relu(x_nchw, weight_oihw, bias, gamma, beta, *, stride=1,
                    padding="same", eps=1e-5, compute_dtype=jnp.float32):
    """Forward pass of CONV_3x3 (conv -> bn(train batch stats) -> relu). NCHW in/out."""
    N, Cin, H, W = x_nchw.shape
    Cout, _, KH, KW = weight_oihw.shape

    if padding == "same":
        p = (KH - 1) // 2
    elif padding == "valid":
        p = 0
    else:
        raise Exception("padding should be either same or valid")

    OH = (H + 2 * p - KH) // stride + 1
    OW = (W + 2 * p - KW) // stride + 1
    OHW = OH * OW
    K = KH * KW * Cin
    Cpad8 = _round_up(Cout, 8)          # channels on sublanes

    # The conv bias is exactly cancelled by train-mode BatchNorm mean subtraction
    # (valid ONLY because BN uses batch stats and nothing sits between conv & BN).
    del bias  # TODO(synk): re-apply bias if BN is ever switched to eval-mode running stats.

    # ---- glue (XLA, once): im2col patch slab with flattened spatial on lanes ----
    x_pad = jnp.pad(jnp.transpose(x_nchw, (0, 2, 3, 1)),
                    ((0, 0), (p, p), (p, p), (0, 0)))           # (N, Hp, Wp, Cin)
    taps = []
    for i in range(KH):
        for j in range(KW):
            tap = jax.lax.slice(
                x_pad,
                (0, i, j, 0),
                (N, i + (OH - 1) * stride + 1, j + (OW - 1) * stride + 1, Cin),
                (1, stride, stride, 1))                          # (N, OH, OW, Cin)
            taps.append(tap)
    patches = jnp.concatenate(taps, axis=-1)                     # (N, OH, OW, K), K=(kh,kw,cin)
    patches = jnp.transpose(patches.reshape(N, OHW, K), (0, 2, 1))  # (N, K, OHW)

    # Spatial tiling over flattened OH*OW: lane-dense r_tile (multiple of 128),
    # capped so the fp32 (Cpad8, r_tile) accumulator stays within ~32 vregs.
    ohw128 = _round_up(OHW, 128)
    cap = min(2048, max(128, ((128 * 1024) // (Cpad8 * 4)) // 128 * 128))
    if ohw128 <= cap:
        r_tile = ohw128
    else:
        r_tile = 128
        while r_tile * 2 <= cap and r_tile * 2 <= ohw128:
            r_tile *= 2
    OHW_pad = _round_up(OHW, r_tile)
    T = OHW_pad // r_tile

    # Zero-pad the spatial tail: zero patches produce conv == 0 -> contribute 0
    # to sum and sum-of-squares, so BN statistics stay exact.
    patches = jnp.pad(patches, ((0, 0), (0, 0), (0, OHW_pad - OHW))
                      ).astype(compute_dtype)

    # weight (Cout, Cin, KH, KW) -> (Cpad8, K) with K ordered (kh, kw, cin),
    # matching the tap concatenation order above.
    w_t = jnp.transpose(weight_oihw, (0, 2, 3, 1)).reshape(Cout, K)
    w_t = jnp.pad(w_t, ((0, Cpad8 - Cout), (0, 0))).astype(compute_dtype)

    itemsize = jnp.dtype(compute_dtype).itemsize
    out_itemsize = jnp.dtype(x_nchw.dtype).itemsize
    flops = 2 * N * T * Cpad8 * r_tile * K
    vmem_limit = _vmem_limit_bytes()

    # ---------------- Pass 1: conv (not stored) + partial BN stats -----------
    psum, psumsq = pl.pallas_call(
        _conv_stats_kernel,
        grid=(N, T),
        in_specs=[
            pl.BlockSpec((Cpad8, K), lambda n, t: (0, 0)),
            pl.BlockSpec((None, K, r_tile), lambda n, t: (n, 0, t)),
        ],
        out_specs=(
            pl.BlockSpec((None, None, Cpad8, 1), lambda n, t: (n, t, 0, 0)),
            pl.BlockSpec((None, None, Cpad8, 1), lambda n, t: (n, t, 0, 0)),
        ),
        out_shape=(
            jax.ShapeDtypeStruct((N, T, Cpad8, 1), jnp.float32),
            jax.ShapeDtypeStruct((N, T, Cpad8, 1), jnp.float32),
        ),
        compiler_params=pltpu.CompilerParams(
            dimension_semantics=("parallel", "parallel"),
            vmem_limit_bytes=vmem_limit),
        cost_estimate=pl.CostEstimate(
            flops=flops, transcendentals=0,
            bytes_accessed=int(patches.size * itemsize + w_t.size * itemsize
                               + 2 * N * T * Cpad8 * 4)),
    )(w_t, patches)

    # --------- tiny per-channel finalize (O(Cout)) in plain JAX --------------
    # TODO(synk): E[x^2]-E[x]^2 is cancellation-prone if |mean| >> std; switch to
    # shifted sums if that regime ever matters for this layer.
    r_count = float(N * OH * OW)
    total_sum = psum.sum(axis=(0, 1))[:, 0]       # (Cpad8,)
    total_sumsq = psumsq.sum(axis=(0, 1))[:, 0]   # (Cpad8,)
    mean = total_sum / r_count
    var = jnp.maximum(total_sumsq / r_count - mean * mean, 0.0)
    gamma_p = jnp.pad(gamma.astype(jnp.float32), (0, Cpad8 - Cout),
                      constant_values=1.0)
    beta_p = jnp.pad(beta.astype(jnp.float32), (0, Cpad8 - Cout))
    scale_v = gamma_p * jax.lax.rsqrt(var + eps)
    shift_v = beta_p - mean * scale_v
    scale = scale_v.reshape(Cpad8, 1)
    shift = shift_v.reshape(Cpad8, 1)

    # ------- Pass 2: recompute conv (fused) + folded BN affine + ReLU --------
    out_full = pl.pallas_call(
        _conv_bn_relu_kernel,
        grid=(N, T),
        in_specs=[
            pl.BlockSpec((Cpad8, K), lambda n, t: (0, 0)),
            pl.BlockSpec((None, K, r_tile), lambda n, t: (n, 0, t)),
            pl.BlockSpec((Cpad8, 1), lambda n, t: (0, 0)),
            pl.BlockSpec((Cpad8, 1), lambda n, t: (0, 0)),
        ],
        out_specs=pl.BlockSpec((None, Cpad8, r_tile), lambda n, t: (n, 0, t)),
        out_shape=jax.ShapeDtypeStruct((N, Cpad8, OHW_pad), x_nchw.dtype),
        compiler_params=pltpu.CompilerParams(
            dimension_semantics=("parallel", "parallel"),
            vmem_limit_bytes=vmem_limit),
        cost_estimate=pl.CostEstimate(
            flops=flops, transcendentals=0,
            bytes_accessed=int(patches.size * itemsize + w_t.size * itemsize
                               + N * Cpad8 * OHW_pad * out_itemsize)),
    )(w_t, patches, scale, shift)

    # Output is already channel-major (N, C, OH*OW); any slicing here is a narrow
    # tail at true output size (often a no-op), and the reshape is free.
    return out_full[:, :Cout, :OHW].reshape(N, Cout, OH, OW)


def _reference(x_nchw, w_oihw, bias, gamma, beta, stride, padding, eps=1e-5):
    """Pure-JAX reference matching PyTorch Conv2d + BatchNorm2d(train) + ReLU."""
    KH = w_oihw.shape[2]
    p = (KH - 1) // 2 if padding == "same" else 0
    y = jax.lax.conv_general_dilated(
        x_nchw, w_oihw, window_strides=(stride, stride),
        padding=[(p, p), (p, p)],
        dimension_numbers=("NCHW", "OIHW", "NCHW"))
    if bias is not None:
        y = y + bias.reshape(1, -1, 1, 1)
    mean = y.mean(axis=(0, 2, 3), keepdims=True)
    var = ((y - mean) ** 2).mean(axis=(0, 2, 3), keepdims=True)
    y = (y - mean) / jnp.sqrt(var + eps)
    y = y * gamma.reshape(1, -1, 1, 1) + beta.reshape(1, -1, 1, 1)
    return jnp.maximum(y, 0.0)


if __name__ == "__main__":
    # CONV_3x3(inplanes=4, outplanes=8, kernelsize=3, stride=1,
    #          padding='same', bias=False)
    N, Cin, Cout, H, W = 2, 4, 8, 16, 16
    KH = KW = 3
    stride, padding, use_bias = 1, "same", False

    key = jax.random.PRNGKey(0)
    kx, kw_, kg, kb = jax.random.split(key, 4)
    x = jax.random.normal(kx, (N, Cin, H, W), jnp.float32)
    weight = 0.1 * jax.random.normal(kw_, (Cout, Cin, KH, KW), jnp.float32)
    bias = None if not use_bias else jnp.zeros((Cout,), jnp.float32)
    gamma = 1.0 + 0.1 * jax.random.normal(kg, (Cout,), jnp.float32)
    beta = 0.1 * jax.random.normal(kb, (Cout,), jnp.float32)

    ref = _reference(x, weight, bias, gamma, beta, stride, padding)

    # fp32 MXU-input path: tight check against the reference.
    out = conv3x3_bn_relu(x, weight, bias, gamma, beta,
                          stride=stride, padding=padding,
                          compute_dtype=jnp.float32)
    out = jax.block_until_ready(out)
    assert out.shape == ref.shape == (N, Cout, H, W)
    assert jnp.allclose(out, ref, atol=2e-4, rtol=2e-4), (
        float(jnp.max(jnp.abs(out - ref))))

    # bf16 MXU-input path (v6e/v7x fast path, fp32 accumulation): loose check.
    out_bf16 = conv3x3_bn_relu(x, weight, bias, gamma, beta,
                               stride=stride, padding=padding,
                               compute_dtype=jnp.bfloat16)
    out_bf16 = jax.block_until_ready(out_bf16)
    assert jnp.allclose(out_bf16, ref, atol=1e-1, rtol=1e-1), (
        float(jnp.max(jnp.abs(out_bf16 - ref))))

    print("KERNEL_OK")
</pallas_src>

<mosaic_0001>
module attributes {stable_mosaic.version = 11 : i64} {
  func.func @_conv_stats_kernel(%arg0: i32, %arg1: i32, %arg2: memref<8x36xf32, #tpu.memory_space<vmem>>, %arg3: memref<1x36x256xf32, #tpu.memory_space<vmem>>, %arg4: memref<1x1x8x1xf32, #tpu.memory_space<vmem>>, %arg5: memref<1x1x8x1xf32, #tpu.memory_space<vmem>>) attributes {dimension_semantics = [#tpu.dimension_semantics<parallel>, #tpu.dimension_semantics<parallel>], iteration_bounds = array<i64: 2, 1>, scalar_prefetch = 0 : i64, scratch_operands = 0 : i64, tpu.core_type = #tpu.core_type<tc>, window_params = [{pipeline_mode = #tpu.pipeline_mode<synchronous>, transform_indices = @transform_0, window_bounds = array<i64: 8, 36>}, {transform_indices = @transform_1, window_bounds = array<i64: 1, 36, 256>}, {transform_indices = @transform_2, window_bounds = array<i64: 1, 1, 8, 1>}, {transform_indices = @transform_3, window_bounds = array<i64: 1, 1, 8, 1>}]} {
    %c0 = arith.constant 0 : index
    %c0_0 = arith.constant 0 : index
    %0 = vector.load %arg2[%c0, %c0_0] : memref<8x36xf32, #tpu.memory_space<vmem>>, vector<8x36xf32>
    %c0_1 = arith.constant 0 : index
    %c0_2 = arith.constant 0 : index
    %c0_3 = arith.constant 0 : index
    %1 = vector.load %arg3[%c0_1, %c0_2, %c0_3] : memref<1x36x256xf32, #tpu.memory_space<vmem>>, vector<1x36x256xf32>
    %2 = vector.shape_cast %1 : vector<1x36x256xf32> to vector<36x256xf32>
    %cst = arith.constant dense<0.000000e+00> : vector<8x256xf32>
    %3 = tpu.matmul %0, %2, %cst {dimension_numbers = #tpu.dot_dimension_numbers<[1], [0], [0], [1], [0, 0, 1, 1], [], []>} : vector<8x36xf32>, vector<36x256xf32>, vector<8x256xf32> -> vector<8x256xf32>
    %cst_4 = arith.constant dense<0.000000e+00> : vector<8xf32>
    %4 = vector.multi_reduction <add>, %3, %cst_4 [1] : vector<8x256xf32> to vector<8xf32>
    %5 = vector.shape_cast %4 : vector<8xf32> to vector<8x1xf32>
    %c0_5 = arith.constant 0 : index
    %c0_6 = arith.constant 0 : index
    %c0_7 = arith.constant 0 : index
    %c0_8 = arith.constant 0 : index
    %6 = vector.load %arg4[%c0_5, %c0_6, %c0_7, %c0_8] : memref<1x1x8x1xf32, #tpu.memory_space<vmem>>, vector<1x1x8x1xf32>
    %7 = vector.shape_cast %6 : vector<1x1x8x1xf32> to vector<8x1xf32>
    %8 = vector.shape_cast %5 : vector<8x1xf32> to vector<1x1x8x1xf32>
    tpu.vector_store %arg4[%c0_5, %c0_6, %c0_7, %c0_8], %8 {strides = array<i32>} : memref<1x1x8x1xf32, #tpu.memory_space<vmem>>, vector<1x1x8x1xf32>,
    %9 = arith.mulf %3, %3 : vector<8x256xf32>
    %cst_9 = arith.constant dense<0.000000e+00> : vector<8xf32>
    %10 = vector.multi_reduction <add>, %9, %cst_9 [1] : vector<8x256xf32> to vector<8xf32>
    %11 = vector.shape_cast %10 : vector<8xf32> to vector<8x1xf32>
    %c0_10 = arith.constant 0 : index
    %c0_11 = arith.constant 0 : index
    %c0_12 = arith.constant 0 : index
    %c0_13 = arith.constant 0 : index
    %12 = vector.load %arg5[%c0_10, %c0_11, %c0_12, %c0_13] : memref<1x1x8x1xf32, #tpu.memory_space<vmem>>, vector<1x1x8x1xf32>
    %13 = vector.shape_cast %12 : vector<1x1x8x1xf32> to vector<8x1xf32>
    %14 = vector.shape_cast %11 : vector<8x1xf32> to vector<1x1x8x1xf32>
    tpu.vector_store %arg5[%c0_10, %c0_11, %c0_12, %c0_13], %14 {strides = array<i32>} : memref<1x1x8x1xf32, #tpu.memory_space<vmem>>, vector<1x1x8x1xf32>,
    return
  }
  func.func @transform_0(%arg0: i32, %arg1: i32) -> (i32, i32) {
    %c0_i32 = arith.constant 0 : i32
    %c0_i32_0 = arith.constant 0 : i32
    %c0_i32_1 = arith.constant 0 : i32
    return %c0_i32, %c0_i32_0 : i32, i32
  }
  func.func @transform_1(%arg0: i32, %arg1: i32) -> (i32, i32, i32) {
    %c0_i32 = arith.constant 0 : i32
    %c0_i32_0 = arith.constant 0 : i32
    return %arg0, %c0_i32, %arg1 : i32, i32, i32
  }
  func.func @transform_2(%arg0: i32, %arg1: i32) -> (i32, i32, i32, i32) {
    %c0_i32 = arith.constant 0 : i32
    %c0_i32_0 = arith.constant 0 : i32
    %c0_i32_1 = arith.constant 0 : i32
    return %arg0, %arg1, %c0_i32, %c0_i32_0 : i32, i32, i32, i32
  }
  func.func @transform_3(%arg0: i32, %arg1: i32) -> (i32, i32, i32, i32) {
    %c0_i32 = arith.constant 0 : i32
    %c0_i32_0 = arith.constant 0 : i32
    %c0_i32_1 = arith.constant 0 : i32
    return %arg0, %arg1, %c0_i32, %c0_i32_0 : i32, i32, i32, i32
  }
}

</mosaic_0001>

<bundles_post_ra>
// kernel: tpu_custom_call.1
= control target key start
LH: loop header
LB: loop body
LE: loop exit
PB: predicated region body
PF: predicated region fallthrough
CT: control target
= control target key end

     0   :  { %s498_s12 = smov 0   ;;  %s500_s13 = smov 0   ;;  %s541_s0 = inlined_call_operand.vmem [shape: f32[8,36], index: 0, kind: input, shape index: {}]   ;;  %s542_s1 = inlined_call_operand.vmem [shape: f32[2,36,256], index: 1, kind: input, shape index: {}]   ;;  %s543_s2 = inlined_call_operand.vmem [shape: f32[2,1,8,1], index: 2, kind: output, shape index: {0}]   ;;  %s544_s3 = inlined_call_operand.vmem [shape: f32[2,1,8,1], index: 3, kind: output, shape index: {1}]  }
   0x1   :  { %s502_s14 = smov 0  }
   0x2 LB: > { %s26_s15 = sadd.s32 1, %s472_s13  ;;  %p419_p0 = scmp.ge.s32.totalorder %s476_s14, 1  ;;  %s476_s14 = sphi %s502_s14, %s14_s14   ;;  %s472_s13 = sphi %s500_s13, %s546_s13   ;;  %s468_s12 = sphi %s498_s12, %s545_s12  }
   0x3   : > { %p28_p1 = scmp.ge.s32.totalorder %s26_s15, 2  ;;  %p163_p2 = scmp.lt.s32.totalorder %s476_s14, 3 }
   0x5   : > { %s548_s15 = smov (%p28_p1, %s26_s15), 0  ;;  %p164_p3 = pnand %p419_p0, %p163_p2 }
   0x6   : > { %p201_p4 = scmp.lt.s32.totalorder (!%p164_p3), %s468_s12, 1 }
   0x7   : > { %167 = sbr.rel (%p164_p3) target bundleno = 279 (0x117), region = 28 }
   0xc   : > { %s550_s12 = smov (!%p201_p4, %s468_s12), 1  ;;  %vm239_vm0 = vcmask 1043456   ;;  %v224_v10 = vld [vmem:[%s541_s0] sm:$0xff]  ;;  %vm235_vm1 = vcmask 293888   ;;  %vm289_vm2 = vcmask 7168  }
   0xd   : > { %s429_s16 = smul.u32 80, %s550_s12  ;;  %s421_s22 = sshll.u32 %s550_s12, 3 }
   0xe   : > { %s216_s25 = scalar_lea.vmem %s543_s2, %s421_s22  ;;  %s223_s28 = scalar_lea.vmem %s544_s3, %s421_s22 }
   0xf   : > { %s208_s19 = scalar_lea.vmem %s542_s1, %s429_s16 }
  0x10   : > { %v233_v0 = vld [vmem:[%s208_s19 + $0x40] sm:$0xf]  ;;  %v234_v1 = vld [vmem:[%s208_s19 + $0x48] sm:$0xf]  ;;  %v231_v2 = vld [vmem:[%s208_s19 + $0x30] sm:$0xff] }
  0x11   : > { %423 = vmatpush.msk.msra.mxu0 %vm239_vm0, %v233_v0  ;;  %425 = vmatpush.msk.msra.mxu1 %vm239_vm0, %v234_v1  ;;  %v232_v3 = vld [vmem:[%s208_s19 + $0x38] sm:$0xff]  ;;  %v229_v4 = vld [vmem:[%s208_s19 + $0x20] sm:$0xff]  ;;  %v230_v5 = vld [vmem:[%s208_s19 + $0x28] sm:$0xff] }
  0x12   : > { %v227_v6 = vld [vmem:[%s208_s19 + $0x10] sm:$0xff]  ;;  %v228_v7 = vld [vmem:[%s208_s19 + $0x18] sm:$0xff]  ;;  %v225_v8 = vld [vmem:[%s208_s19] sm:$0xff] }
  0x13   : > { %258 = vmatpush.msra.mxu0 %v231_v2  ;;  %278 = vmatpush.msra.mxu1 %v232_v3  ;;  %v226_v9 = vld [vmem:[%s208_s19 + $0x8] sm:$0xff] }
  0x15   : > { %259 = vmatpush.msra.mxu0 %v229_v4  ;;  %279 = vmatpush.msra.mxu1 %v230_v5 }
  0x17   : > { %260 = vmatpush.msra.mxu0 %v227_v6  ;;  %280 = vmatpush.msra.mxu1 %v228_v7 }
  0x19   : > { %261 = vmatpush.msra.mxu0 %v225_v8  ;;  %281 = vmatpush.msra.mxu1 %v226_v9 }
  0x1a   : > { %424 = vmatmul.msk.f32.vlgmr.msra.gmra.mxu0 %vm235_vm1, %v224_v10  ;;  %426 = vmatmul.msk.f32.vlgmr.msra.gmra.mxu1 %vm235_vm1, %v224_v10 }
  0x97   : > { %v263_v11 = vpop.f32.mrf.mxu0  ;;  %v283_v12 = vpop.f32.mrf.mxu1 }
  0x98   : > { %v286_v13 = vadd.f32 %v283_v12, %v263_v11  ;;  %v291_v14 = vmul.f32 %v263_v11, %v263_v11  ;;  %v292_v15 = vmul.f32 %v283_v12, %v283_v12 }
  0x9a   : > { %287 = vadd.xlane.f32.xlu0 %v286_v13  ;;  %v293_v16 = vadd.f32 %v292_v15, %v291_v14 }
  0xa2   : > { %294 = vadd.xlane.f32.xlu0 %v293_v16 }
 0x10d   : > { %v288_v17 = vpop.xlane.xlu0 %287 }
 0x10e   : > { %290 = vst.msk [vmem:[%s216_s25] sm:$0xff] %vm289_vm2, %v288_v17 }
 0x115   : > { %v295_v18 = vpop.xlane.xlu0 %294 }
 0x116   : > { %296 = vst.msk [vmem:[%s223_s28] sm:$0xff] %vm289_vm2, %v295_v18 }
 0x117 PF: > { %s14_s14 = sadd.s32 1, %s476_s14   ;;  %s545_s12 = smov %s472_s13 }
 0x118   : > { %p11_p5 = scmp.ge.s32.totalorder %s14_s14, 4   ;;  %s546_s13 = smov %s548_s15 }
 0x11a   :  { %13 = sbr.rel (!%p11_p5) target bundleno = 2 (0x2), region = 70 }

</bundles_post_ra>
